<compile_context>
chip_gen: v6e
topology: v6e:2x2x1
jax: 0.10.0
libtpu: 0.0.40
codegen_flags: <defaults>
</compile_context>

<pallas_src>
import numpy as np

import jax
import jax.numpy as jnp
from jax.experimental import pallas as pl
from jax.experimental.pallas import tpu as pltpu


def _drop_path_kernel(x_ref, mask_ref, o_ref):
    # (rows, tile) * (rows, 1) broadcast multiply, kept in the input dtype.
    o_ref[...] = x_ref[...] * mask_ref[...]


def _pick_rows_per_sample(batch, feat):
    """Split each sample into r rows so the sublane dim (batch * r) is >= 8."""
    if batch >= 8:
        return 1
    target = -(-8 // batch)  # ceil(8 / batch)
    for cand in range(target, 0, -1):
        if feat % cand == 0:
            return cand
    return 1


def _pick_feature_tile(rows, feat_row, itemsize, vmem_budget_bytes):
    """Largest lane-aligned divisor of feat_row that fits the VMEM budget."""
    if feat_row % 128 != 0:
        return feat_row  # full-row block (allowed: equals the array dim)
    # 4 buffers of (rows, tile): double-buffered input + double-buffered output.
    max_tile = vmem_budget_bytes // (4 * rows * itemsize)
    max_tile = max(128, (max_tile // 128) * 128)
    if max_tile >= feat_row:
        return feat_row
    n128 = feat_row // 128
    best = 128
    for d in range(1, n128 + 1):
        if n128 % d == 0 and d * 128 <= max_tile:
            best = d * 128
    return best


def drop_path_pallas(x, key, drop_prob=0.0, training=False, scale_by_keep=True,
                     vmem_budget_bytes=24 << 20):
    """Pallas implementation of timm-style drop_path for NCHW (or any) input."""
    if drop_prob == 0.0 or not training:
        return x
    keep_prob = 1.0 - drop_prob

    B = x.shape[0]
    F = int(np.prod(x.shape[1:]))

    # Per-sample keep mask, computed once (hoisted out of the kernel hot path).
    keep = jax.random.bernoulli(key, p=keep_prob, shape=(B, 1)).astype(x.dtype)
    if keep_prob > 0.0 and scale_by_keep:
        keep = keep / jnp.asarray(keep_prob, dtype=x.dtype)

    # Sublane fill for small batches: (B, F) -> (B*r, F//r); row-major reshape
    # keeps sample b in rows [b*r, (b+1)*r), so repeating the mask r-fold per
    # sample preserves the per-sample broadcast semantics exactly.
    r = _pick_rows_per_sample(B, F)
    rows, Fr = B * r, F // r
    x2 = x.reshape(rows, Fr)
    mask = jnp.repeat(keep, r, axis=0) if r > 1 else keep  # (rows, 1)

    itemsize = jnp.dtype(x.dtype).itemsize
    tile = _pick_feature_tile(rows, Fr, itemsize, vmem_budget_bytes)

    out2 = pl.pallas_call(
        _drop_path_kernel,
        out_shape=jax.ShapeDtypeStruct((rows, Fr), x.dtype),
        grid=(Fr // tile,),
        in_specs=[
            pl.BlockSpec((rows, tile), lambda j: (0, j)),
            pl.BlockSpec((rows, 1), lambda j: (0, 0)),  # full (tiny) mask array
        ],
        out_specs=pl.BlockSpec((rows, tile), lambda j: (0, j)),
        compiler_params=pltpu.CompilerParams(
            dimension_semantics=("parallel",),
            vmem_limit_bytes=48 << 20,
        ),
    )(x2, mask)

    return out2.reshape(x.shape)


class DropPath:
    """JAX/Pallas analogue of the PyTorch DropPath module.

    NOTE: callers should derive a distinct seed/key per layer and per step so
    different DropPath layers do not share drop decisions.
    """

    def __init__(self, drop_prob: float = 0.0, scale_by_keep: bool = True):
        self.drop_prob = drop_prob
        self.scale_by_keep = scale_by_keep
        self.training = True

    def __call__(self, x, seed=0):
        key = jax.random.PRNGKey(seed)
        return drop_path_pallas(
            x,
            key,
            drop_prob=self.drop_prob,
            training=self.training,
            scale_by_keep=self.scale_by_keep,
        )


if __name__ == "__main__":
    key = jax.random.PRNGKey(0)
    B, C, H, W = 2, 4, 16, 16
    x = jax.random.normal(key, (B, C, H, W), dtype=jnp.float32)

    module = DropPath(drop_prob=0.3, scale_by_keep=True)
    module.training = True

    out = module(x, seed=123)
    out = jax.block_until_ready(out)

    # Sanity: each sample is either all-zeros or exactly x / keep_prob.
    keep_prob = 1.0 - module.drop_prob
    out_np = np.asarray(out)
    x_np = np.asarray(x)
    for b in range(B):
        zero = np.allclose(out_np[b], 0.0)
        scaled = np.allclose(out_np[b], x_np[b] / keep_prob, rtol=1e-5, atol=1e-5)
        assert zero or scaled, f"sample {b}: not a valid drop-path output"

    # Eval mode / drop_prob=0 path is identity (handled in wrapper, like torch).
    module.training = False
    out_eval = jax.block_until_ready(module(x, seed=123))
    assert np.allclose(np.asarray(out_eval), x_np)

    module.training = True
    module.drop_prob = 0.0
    out_p0 = jax.block_until_ready(module(x, seed=123))
    assert np.allclose(np.asarray(out_p0), x_np)

    print("KERNEL_OK")
</pallas_src>

<mosaic_0001>
module attributes {stable_mosaic.version = 11 : i64} {
  func.func @_drop_path_kernel(%arg0: i32, %arg1: memref<8x256xf32, #tpu.memory_space<vmem>>, %arg2: memref<8x1xf32, #tpu.memory_space<vmem>>, %arg3: memref<8x256xf32, #tpu.memory_space<vmem>>) attributes {dimension_semantics = [#tpu.dimension_semantics<parallel>], iteration_bounds = array<i64: 1>, scalar_prefetch = 0 : i64, scratch_operands = 0 : i64, tpu.core_type = #tpu.core_type<tc>, window_params = [{transform_indices = @transform_0, window_bounds = array<i64: 8, 256>}, {pipeline_mode = #tpu.pipeline_mode<synchronous>, transform_indices = @transform_1, window_bounds = array<i64: 8, 1>}, {transform_indices = @transform_2, window_bounds = array<i64: 8, 256>}]} {
    %c0 = arith.constant 0 : index
    %c0_0 = arith.constant 0 : index
    %0 = vector.load %arg1[%c0, %c0_0] : memref<8x256xf32, #tpu.memory_space<vmem>>, vector<8x256xf32>
    %c0_1 = arith.constant 0 : index
    %c0_2 = arith.constant 0 : index
    %1 = vector.load %arg2[%c0_1, %c0_2] : memref<8x1xf32, #tpu.memory_space<vmem>>, vector<8x1xf32>
    %2 = vector.broadcast %1 : vector<8x1xf32> to vector<8x256xf32>
    %3 = arith.mulf %0, %2 : vector<8x256xf32>
    %c0_3 = arith.constant 0 : index
    %c0_4 = arith.constant 0 : index
    %4 = vector.load %arg3[%c0_3, %c0_4] : memref<8x256xf32, #tpu.memory_space<vmem>>, vector<8x256xf32>
    tpu.vector_store %arg3[%c0_3, %c0_4], %3 {strides = array<i32>} : memref<8x256xf32, #tpu.memory_space<vmem>>, vector<8x256xf32>,
    return
  }
  func.func @transform_0(%arg0: i32) -> (i32, i32) {
    %c0_i32 = arith.constant 0 : i32
    %c0_i32_0 = arith.constant 0 : i32
    return %c0_i32, %arg0 : i32, i32
  }
  func.func @transform_1(%arg0: i32) -> (i32, i32) {
    %c0_i32 = arith.constant 0 : i32
    %c0_i32_0 = arith.constant 0 : i32
    %c0_i32_1 = arith.constant 0 : i32
    return %c0_i32, %c0_i32_0 : i32, i32
  }
  func.func @transform_2(%arg0: i32) -> (i32, i32) {
    %c0_i32 = arith.constant 0 : i32
    %c0_i32_0 = arith.constant 0 : i32
    return %c0_i32, %arg0 : i32, i32
  }
}

</mosaic_0001>

<bundles_post_ra>
// kernel: tpu_custom_call.1
= control target key start
LH: loop header
LB: loop body
LE: loop exit
PB: predicated region body
PF: predicated region fallthrough
CT: control target
= control target key end

     0   :  { %7 = vsyncpa [#allocation3], 0  ;;  %s126_s0 = inlined_call_operand.hbm [shape: f32[8,256], index: 0, kind: input, shape index: {}]   ;;  %s127_s1 = inlined_call_operand.vmem [shape: f32[8,1], index: 1, kind: input, shape index: {}]   ;;  %s128_s2 = inlined_call_operand.hbm [shape: f32[8,256], index: 2, kind: output, shape index: {}]  }
   0x1   :  { %8 = vsyncpa [#allocation4], 0  ;;  %s99_s9 = smov [#allocation2]  }
   0x2   :  { %s15_s10 = sshll.u32 %s99_s9, 4  ;;  %s16_s10 = int_to_ptr.vmem [resolvable:$true] %s15_s10 }
   0x3   :  { %s63_s11 = scalar_lea.vmem %s16_s10, 256  ;;  %p68_p1 = scmp.lt.s32.totalorder %s16_s10, %s16_s10 }
   0x4   :  { %p64_p0 = scmp.ne.s32.totalorder %s16_s10, %s63_s11  ;;  %p69_p2 = scmp.lt.s32.totalorder %s63_s11, %s63_s11 }
   0x6   :  { %p70_p3 = por %p69_p2, %p68_p1 }
   0x8   :  { %p71_p4 = pnand %p70_p3, %p64_p0 }
   0xa   :  { %74 = shalt.err (!%p71_p4)
}
   0xb   :  { %18 = dma.hbm_to_vmem [thread:$0]  %s126_s0, 256, %s16_s10, [#allocation3]  }
   0xc   :  { %95 = dma.done.wait [#allocation3], 256  }
   0xd   :  { %96 = vsyncadd [#allocation3], 4294967040  ;;  %v100_v0 = vmov 0   ;;  %v26_v1 = vld [vmem:[%s127_s1] sm:$0xff]  ;;  %v25_v3 = vld [vmem:[#allocation2 + $0x8] sm:$0xff]  ;;  %s101_s16 = smov [#allocation5]  }
   0xe   :  { %54 = vset.pattern.permute.xlu0 %v100_v0  ;;  %v24_v2 = vld [vmem:[#allocation2] sm:$0xff]  ;;  %s42_s17 = sshll.u32 %s101_s16, 4  ;;  %s43_s17 = int_to_ptr.vmem [resolvable:$true] %s42_s17 }
   0xf   :  { %29 = vperm.xlu0 %54, %v26_v1   ;;  %s75_s0 = scalar_lea.vmem %s43_s17, 256  ;;  %p80_p6 = scmp.lt.s32.totalorder %s43_s17, %s43_s17 }
  0x10   :  { %p76_p5 = scmp.ne.s32.totalorder %s43_s17, %s75_s0  ;;  %p81_p7 = scmp.lt.s32.totalorder %s75_s0, %s75_s0 }
  0x12   :  { %p82_p8 = por %p81_p7, %p80_p6 }
  0x14   :  { %p83_p9 = pnand %p82_p8, %p76_p5 }
  0x8a   :  { %v30_v4 = vpop.permute.xlu0 %29 }
  0x8b   :  { %v32_v5 = vmul.f32 %v30_v4, %v24_v2  ;;  %v33_v6 = vmul.f32 %v30_v4, %v25_v3 }
  0x8d   :  { %34 = vst [vmem:[#allocation5] sm:$0xff] %v32_v5  ;;  %35 = vst [vmem:[#allocation5 + $0x8] sm:$0xff] %v33_v6 }
  0x8e   :  { %86 = shalt.err (!%p83_p9)
}
  0x8f   :  { %45 = dma.vmem_to_hbm [thread:$0]  %s43_s17, 256, %s128_s2, [#allocation4]  }
  0x90   :  { %97 = dma.done.wait [#allocation4], 256  }
  0x91   :  { %98 = vsyncadd [#allocation4], 4294967040 }
  0x92   :  { %49 = vsyncpa [#allocation3], 1 }
  0x93   :  { %50 = vsyncpa [#allocation4], 1 }

</bundles_post_ra>
